<compile_context>
chip_gen: v6e
topology: v6e:2x2x1
jax: 0.10.0
libtpu: 0.0.40
codegen_flags: <defaults>
</compile_context>

<pallas_src>
import functools

import jax
import jax.numpy as jnp
from jax.experimental import pallas as pl
from jax.experimental.pallas import tpu as pltpu


# ----------------------------------------------------------------------------
# Kernel: one batch tile of the whole MLP (2 MXU matmuls + bias/ReLU + lane
#         reduction for the scalar Q head), all operands resident in VMEM.
# ----------------------------------------------------------------------------
def critic_kernel(s_ref, a_ref, w1s_ref, w1a_ref, b1_ref,
                  w2_ref, b2_ref, wq_ref, bq_ref, q_ref):
    # fc1: split-input matmul replaces the HBM concat of [state, action].
    h1 = jnp.dot(s_ref[...], w1s_ref[...], preferred_element_type=jnp.float32)
    h1 = h1 + jnp.dot(a_ref[...], w1a_ref[...], preferred_element_type=jnp.float32)
    h1 = jnp.maximum(h1 + b1_ref[...], 0.0)                           # [TB, fc1]

    # fc2
    h2 = jnp.dot(h1, w2_ref[...], preferred_element_type=jnp.float32)  # [TB, fc2]
    h2 = jnp.maximum(h2 + b2_ref[...], 0.0)

    # q head (out_features == 1): multiply + lane reduce on VPU/XLU instead of a
    # 1-column MXU matmul.
    q = jnp.sum(h2 * wq_ref[...], axis=-1, keepdims=True)              # [TB, 1]
    q_ref[...] = q + bq_ref[...]


def _round_up(x, m):
    return (x + m - 1) // m * m


# ----------------------------------------------------------------------------
# One-time parameter preparation (outside the hot path): transpose to [in, out],
# split W1 by input rows, reshape biases to 2-D rows.
# ----------------------------------------------------------------------------
def prepare_params(params, state_dim):
    w1, b1, w2, b2, wq, bq = params                 # PyTorch layout: weight [out, in]
    w1_t = jnp.asarray(w1, jnp.float32).T           # [S+A, fc1]
    return (
        w1_t[:state_dim],                           # W1_s  [S,  fc1]
        w1_t[state_dim:],                           # W1_a  [A,  fc1]
        jnp.asarray(b1, jnp.float32).reshape(1, -1),
        jnp.asarray(w2, jnp.float32).T,             # [fc1, fc2]
        jnp.asarray(b2, jnp.float32).reshape(1, -1),
        jnp.asarray(wq, jnp.float32).reshape(1, -1),  # [1, fc2]  (already "row" layout)
        jnp.asarray(bq, jnp.float32).reshape(1, 1),
    )


# ----------------------------------------------------------------------------
# Forward wrapper: batch grid, resident weights, parallel batch axis.
# ----------------------------------------------------------------------------
@functools.partial(jax.jit, static_argnames=("tb",))
def critic_forward(state, action, prep, *, tb=512):
    """state: [B, S], action: [B, A], prep = prepare_params(...) -> q: [B, 1]"""
    w1s, w1a, b1, w2, b2, wq, bq = prep
    state = state.astype(jnp.float32)
    action = action.astype(jnp.float32)

    B, S = state.shape
    A = action.shape[1]

    # Batch tile: multiple of 8 (f32 sublane), capped at `tb` rows.
    TB = min(tb, _round_up(B, 8))
    Bp = _round_up(B, TB)
    if Bp != B:
        state = jnp.pad(state, ((0, Bp - B), (0, 0)))
        action = jnp.pad(action, ((0, Bp - B), (0, 0)))

    grid = (Bp // TB,)

    # Activations tiled over batch; weights/biases use a constant index_map so they
    # are DMA'd once and stay resident in VMEM across grid steps.
    in_specs = [
        pl.BlockSpec((TB, S), lambda i: (i, 0)),          # state tile
        pl.BlockSpec((TB, A), lambda i: (i, 0)),          # action tile
        pl.BlockSpec(w1s.shape, lambda i: (0, 0)),
        pl.BlockSpec(w1a.shape, lambda i: (0, 0)),
        pl.BlockSpec(b1.shape, lambda i: (0, 0)),
        pl.BlockSpec(w2.shape, lambda i: (0, 0)),
        pl.BlockSpec(b2.shape, lambda i: (0, 0)),
        pl.BlockSpec(wq.shape, lambda i: (0, 0)),
        pl.BlockSpec(bq.shape, lambda i: (0, 0)),
    ]
    out_spec = pl.BlockSpec((TB, 1), lambda i: (i, 0))

    q = pl.pallas_call(
        critic_kernel,
        out_shape=jax.ShapeDtypeStruct((Bp, 1), jnp.float32),
        grid=grid,
        in_specs=in_specs,
        out_specs=out_spec,
        compiler_params=pltpu.CompilerParams(
            dimension_semantics=("parallel",)),   # batch tiles are independent
    )(state, action, w1s, w1a, b1, w2, b2, wq, bq)

    return q[:B]


# ----------------------------------------------------------------------------
# Deterministic parameter init (matches nn.Linear shapes: weight [out, in]).
# ----------------------------------------------------------------------------
def init_params(key, state_dim, action_dim, fc1_dim, fc2_dim):
    k = jax.random.split(key, 6)
    in1 = state_dim + action_dim

    def uniform(key, shape, fan_in):
        bound = 1.0 / jnp.sqrt(fan_in)
        return jax.random.uniform(key, shape, jnp.float32, -bound, bound)

    w1 = uniform(k[0], (fc1_dim, in1), in1)
    b1 = uniform(k[1], (fc1_dim,), in1)
    w2 = uniform(k[2], (fc2_dim, fc1_dim), fc1_dim)
    b2 = uniform(k[3], (fc2_dim,), fc1_dim)
    wq = uniform(k[4], (1, fc2_dim), fc2_dim)
    bq = uniform(k[5], (1,), fc2_dim)
    return (w1, b1, w2, b2, wq, bq)


# ----------------------------------------------------------------------------
# Pure-JAX reference (mirrors the PyTorch forward exactly).
# ----------------------------------------------------------------------------
def critic_ref(state, action, params):
    w1, b1, w2, b2, wq, bq = params
    x = jnp.concatenate([state, action], axis=1)
    x = jax.nn.relu(x @ w1.T + b1)
    x = jax.nn.relu(x @ w2.T + b2)
    return x @ wq.T + bq


if __name__ == "__main__":
    B, state_dim, action_dim, fc1_dim, fc2_dim = 2, 8, 4, 32, 32

    key = jax.random.PRNGKey(0)
    k_state, k_action, k_params = jax.random.split(key, 3)

    state = jax.random.normal(k_state, (B, state_dim), jnp.float32)
    action = jax.random.normal(k_action, (B, action_dim), jnp.float32)
    params = init_params(k_params, state_dim, action_dim, fc1_dim, fc2_dim)

    # One-time layout prep (outside the per-step hot path).
    prep = prepare_params(params, state_dim)

    q = critic_forward(state, action, prep)
    jax.block_until_ready(q)

    q_ref = critic_ref(state, action, params)
    assert q.shape == (B, 1), q.shape
    assert jnp.allclose(q, q_ref, atol=1e-5, rtol=1e-5), (q, q_ref)

    # Also exercise a batched (grid > 1) path to validate the tiling/padding.
    Bb = 1000
    kb = jax.random.split(key, 2)
    state_b = jax.random.normal(kb[0], (Bb, state_dim), jnp.float32)
    action_b = jax.random.normal(kb[1], (Bb, action_dim), jnp.float32)
    q_b = critic_forward(state_b, action_b, prep)
    jax.block_until_ready(q_b)
    q_b_ref = critic_ref(state_b, action_b, params)
    assert q_b.shape == (Bb, 1), q_b.shape
    assert jnp.allclose(q_b, q_b_ref, atol=1e-4, rtol=1e-4)

    print("KERNEL_OK")
</pallas_src>

<mosaic_0001>
module attributes {stable_mosaic.version = 11 : i64} {
  func.func @critic_kernel(%arg0: i32, %arg1: memref<8x8xf32, #tpu.memory_space<vmem>>, %arg2: memref<8x4xf32, #tpu.memory_space<vmem>>, %arg3: memref<8x32xf32, #tpu.memory_space<vmem>>, %arg4: memref<4x32xf32, #tpu.memory_space<vmem>>, %arg5: memref<1x32xf32, #tpu.memory_space<vmem>>, %arg6: memref<32x32xf32, #tpu.memory_space<vmem>>, %arg7: memref<1x32xf32, #tpu.memory_space<vmem>>, %arg8: memref<1x32xf32, #tpu.memory_space<vmem>>, %arg9: memref<1x1xf32, #tpu.memory_space<vmem>>, %arg10: memref<8x1xf32, #tpu.memory_space<vmem>>) attributes {dimension_semantics = [#tpu.dimension_semantics<parallel>], iteration_bounds = array<i64: 1>, scalar_prefetch = 0 : i64, scratch_operands = 0 : i64, tpu.core_type = #tpu.core_type<tc>, window_params = [{transform_indices = @transform_0, window_bounds = array<i64: 8, 8>}, {transform_indices = @transform_1, window_bounds = array<i64: 8, 4>}, {pipeline_mode = #tpu.pipeline_mode<synchronous>, transform_indices = @transform_2, window_bounds = array<i64: 8, 32>}, {pipeline_mode = #tpu.pipeline_mode<synchronous>, transform_indices = @transform_3, window_bounds = array<i64: 4, 32>}, {pipeline_mode = #tpu.pipeline_mode<synchronous>, transform_indices = @transform_4, window_bounds = array<i64: 1, 32>}, {pipeline_mode = #tpu.pipeline_mode<synchronous>, transform_indices = @transform_5, window_bounds = array<i64: 32, 32>}, {pipeline_mode = #tpu.pipeline_mode<synchronous>, transform_indices = @transform_6, window_bounds = array<i64: 1, 32>}, {pipeline_mode = #tpu.pipeline_mode<synchronous>, transform_indices = @transform_7, window_bounds = array<i64: 1, 32>}, {pipeline_mode = #tpu.pipeline_mode<synchronous>, transform_indices = @transform_8, window_bounds = array<i64: 1, 1>}, {transform_indices = @transform_9, window_bounds = array<i64: 8, 1>}]} {
    %c0 = arith.constant 0 : index
    %c0_0 = arith.constant 0 : index
    %0 = vector.load %arg1[%c0, %c0_0] : memref<8x8xf32, #tpu.memory_space<vmem>>, vector<8x8xf32>
    %c0_1 = arith.constant 0 : index
    %c0_2 = arith.constant 0 : index
    %1 = vector.load %arg3[%c0_1, %c0_2] : memref<8x32xf32, #tpu.memory_space<vmem>>, vector<8x32xf32>
    %cst = arith.constant dense<0.000000e+00> : vector<8x32xf32>
    %2 = tpu.matmul %0, %1, %cst {dimension_numbers = #tpu.dot_dimension_numbers<[1], [0], [0], [1], [0, 0, 1, 1], [], []>} : vector<8x8xf32>, vector<8x32xf32>, vector<8x32xf32> -> vector<8x32xf32>
    %c0_3 = arith.constant 0 : index
    %c0_4 = arith.constant 0 : index
    %3 = vector.load %arg2[%c0_3, %c0_4] : memref<8x4xf32, #tpu.memory_space<vmem>>, vector<8x4xf32>
    %c0_5 = arith.constant 0 : index
    %c0_6 = arith.constant 0 : index
    %4 = vector.load %arg4[%c0_5, %c0_6] : memref<4x32xf32, #tpu.memory_space<vmem>>, vector<4x32xf32>
    %cst_7 = arith.constant dense<0.000000e+00> : vector<8x32xf32>
    %5 = tpu.matmul %3, %4, %cst_7 {dimension_numbers = #tpu.dot_dimension_numbers<[1], [0], [0], [1], [0, 0, 1, 1], [], []>} : vector<8x4xf32>, vector<4x32xf32>, vector<8x32xf32> -> vector<8x32xf32>
    %6 = arith.addf %2, %5 : vector<8x32xf32>
    %c0_8 = arith.constant 0 : index
    %c0_9 = arith.constant 0 : index
    %7 = vector.load %arg5[%c0_8, %c0_9] : memref<1x32xf32, #tpu.memory_space<vmem>>, vector<1x32xf32>
    %8 = vector.broadcast %7 : vector<1x32xf32> to vector<8x32xf32>
    %9 = arith.addf %6, %8 : vector<8x32xf32>
    %cst_10 = arith.constant 0.000000e+00 : f32
    %10 = vector.broadcast %cst_10 : f32 to vector<8x32xf32>
    %11 = arith.maximumf %9, %10 : vector<8x32xf32>
    %c0_11 = arith.constant 0 : index
    %c0_12 = arith.constant 0 : index
    %12 = vector.load %arg6[%c0_11, %c0_12] : memref<32x32xf32, #tpu.memory_space<vmem>>, vector<32x32xf32>
    %cst_13 = arith.constant dense<0.000000e+00> : vector<8x32xf32>
    %13 = tpu.matmul %11, %12, %cst_13 {dimension_numbers = #tpu.dot_dimension_numbers<[1], [0], [0], [1], [0, 0, 1, 1], [], []>} : vector<8x32xf32>, vector<32x32xf32>, vector<8x32xf32> -> vector<8x32xf32>
    %c0_14 = arith.constant 0 : index
    %c0_15 = arith.constant 0 : index
    %14 = vector.load %arg7[%c0_14, %c0_15] : memref<1x32xf32, #tpu.memory_space<vmem>>, vector<1x32xf32>
    %15 = vector.broadcast %14 : vector<1x32xf32> to vector<8x32xf32>
    %16 = arith.addf %13, %15 : vector<8x32xf32>
    %cst_16 = arith.constant 0.000000e+00 : f32
    %17 = vector.broadcast %cst_16 : f32 to vector<8x32xf32>
    %18 = arith.maximumf %16, %17 : vector<8x32xf32>
    %c0_17 = arith.constant 0 : index
    %c0_18 = arith.constant 0 : index
    %19 = vector.load %arg8[%c0_17, %c0_18] : memref<1x32xf32, #tpu.memory_space<vmem>>, vector<1x32xf32>
    %20 = vector.broadcast %19 : vector<1x32xf32> to vector<8x32xf32>
    %21 = arith.mulf %18, %20 : vector<8x32xf32>
    %cst_19 = arith.constant dense<0.000000e+00> : vector<8xf32>
    %22 = vector.multi_reduction <add>, %21, %cst_19 [1] : vector<8x32xf32> to vector<8xf32>
    %23 = vector.shape_cast %22 : vector<8xf32> to vector<8x1xf32>
    %c0_20 = arith.constant 0 : index
    %c0_21 = arith.constant 0 : index
    %24 = vector.load %arg9[%c0_20, %c0_21] : memref<1x1xf32, #tpu.memory_space<vmem>>, vector<1x1xf32>
    %25 = vector.broadcast %24 : vector<1x1xf32> to vector<8x1xf32>
    %26 = arith.addf %23, %25 : vector<8x1xf32>
    %c0_22 = arith.constant 0 : index
    %c0_23 = arith.constant 0 : index
    %27 = vector.load %arg10[%c0_22, %c0_23] : memref<8x1xf32, #tpu.memory_space<vmem>>, vector<8x1xf32>
    tpu.vector_store %arg10[%c0_22, %c0_23], %26 {strides = array<i32>} : memref<8x1xf32, #tpu.memory_space<vmem>>, vector<8x1xf32>,
    return
  }
  func.func @transform_0(%arg0: i32) -> (i32, i32) {
    %c0_i32 = arith.constant 0 : i32
    %c0_i32_0 = arith.constant 0 : i32
    return %arg0, %c0_i32 : i32, i32
  }
  func.func @transform_1(%arg0: i32) -> (i32, i32) {
    %c0_i32 = arith.constant 0 : i32
    %c0_i32_0 = arith.constant 0 : i32
    return %arg0, %c0_i32 : i32, i32
  }
  func.func @transform_2(%arg0: i32) -> (i32, i32) {
    %c0_i32 = arith.constant 0 : i32
    %c0_i32_0 = arith.constant 0 : i32
    %c0_i32_1 = arith.constant 0 : i32
    return %c0_i32, %c0_i32_0 : i32, i32
  }
  func.func @transform_3(%arg0: i32) -> (i32, i32) {
    %c0_i32 = arith.constant 0 : i32
    %c0_i32_0 = arith.constant 0 : i32
    %c0_i32_1 = arith.constant 0 : i32
    return %c0_i32, %c0_i32_0 : i32, i32
  }
  func.func @transform_4(%arg0: i32) -> (i32, i32) {
    %c0_i32 = arith.constant 0 : i32
    %c0_i32_0 = arith.constant 0 : i32
    %c0_i32_1 = arith.constant 0 : i32
    return %c0_i32, %c0_i32_0 : i32, i32
  }
  func.func @transform_5(%arg0: i32) -> (i32, i32) {
    %c0_i32 = arith.constant 0 : i32
    %c0_i32_0 = arith.constant 0 : i32
    %c0_i32_1 = arith.constant 0 : i32
    return %c0_i32, %c0_i32_0 : i32, i32
  }
  func.func @transform_6(%arg0: i32) -> (i32, i32) {
    %c0_i32 = arith.constant 0 : i32
    %c0_i32_0 = arith.constant 0 : i32
    %c0_i32_1 = arith.constant 0 : i32
    return %c0_i32, %c0_i32_0 : i32, i32
  }
  func.func @transform_7(%arg0: i32) -> (i32, i32) {
    %c0_i32 = arith.constant 0 : i32
    %c0_i32_0 = arith.constant 0 : i32
    %c0_i32_1 = arith.constant 0 : i32
    return %c0_i32, %c0_i32_0 : i32, i32
  }
  func.func @transform_8(%arg0: i32) -> (i32, i32) {
    %c0_i32 = arith.constant 0 : i32
    %c0_i32_0 = arith.constant 0 : i32
    %c0_i32_1 = arith.constant 0 : i32
    return %c0_i32, %c0_i32_0 : i32, i32
  }
  func.func @transform_9(%arg0: i32) -> (i32, i32) {
    %c0_i32 = arith.constant 0 : i32
    %c0_i32_0 = arith.constant 0 : i32
    return %arg0, %c0_i32 : i32, i32
  }
}

</mosaic_0001>

<bundles_post_ra>
// kernel: critic_forward.1
= control target key start
LH: loop header
LB: loop body
LE: loop exit
PB: predicated region body
PF: predicated region fallthrough
CT: control target
= control target key end

     0   :  { %s515_s0 = inlined_call_operand.vmem [shape: f32[8,8], index: 0, kind: input, shape index: {}]   ;;  %s516_s1 = inlined_call_operand.vmem [shape: f32[8,4], index: 1, kind: input, shape index: {}]   ;;  %s517_s2 = inlined_call_operand.hbm [shape: f32[8,32], index: 2, kind: input, shape index: {}]   ;;  %s518_s3 = inlined_call_operand.hbm [shape: f32[4,32], index: 3, kind: input, shape index: {}]   ;;  %s519_s4 = inlined_call_operand.vmem [shape: f32[1,32], index: 4, kind: input, shape index: {}]   ;;  %s520_s5 = inlined_call_operand.vmem [shape: f32[32,32], index: 5, kind: input, shape index: {}]   ;;  %s521_s6 = inlined_call_operand.vmem [shape: f32[1,32], index: 6, kind: input, shape index: {}]   ;;  %s522_s7 = inlined_call_operand.vmem [shape: f32[1,32], index: 7, kind: input, shape index: {}]   ;;  %s523_s8 = inlined_call_operand.<no memory space> [shape: f32[1,1], index: 8, kind: input, shape index: {}]   ;;  %s524_s9 = inlined_call_operand.vmem [shape: f32[8,1], index: 9, kind: output, shape index: {}]  }
   0x1   :  { %v14_v0 = vstv %s523_s8 }
   0x2   :  { %15 = vst [vmem:[#allocation2] sm:$0x1] %v14_v0 }
   0x3   :  { %16 = vsyncpa [#allocation4], 0 }
   0x4   :  { %17 = vsyncpa [#allocation6], 0  ;;  %s422_s11 = smov [#allocation3]   ;;  %s423_s13 = smov [#allocation5]  }
   0x5   :  { %s28_s12 = sshll.u32 %s422_s11, 4  ;;  %s38_s14 = sshll.u32 %s423_s13, 4  ;;  %s29_s12 = int_to_ptr.vmem [resolvable:$true] %s28_s12  ;;  %s39_s14 = int_to_ptr.vmem [resolvable:$true] %s38_s14 }
   0x6   :  { %s386_s15 = scalar_lea.vmem %s29_s12, 128  ;;  %p391_p1 = scmp.lt.s32.totalorder %s29_s12, %s29_s12 }
   0x7   :  { %p387_p0 = scmp.ne.s32.totalorder %s29_s12, %s386_s15  ;;  %p392_p2 = scmp.lt.s32.totalorder %s386_s15, %s386_s15 }
   0x9   :  { %p393_p3 = por %p392_p2, %p391_p1 }
   0xb   :  { %p394_p4 = pnand %p393_p3, %p387_p0 }
   0xd   :  { %397 = shalt.err (!%p394_p4)
}
   0xe   :  { %31 = dma.hbm_to_vmem [thread:$0]  %s517_s2, 128, %s29_s12, [#allocation4]  }
   0xf   :  { %s406_s8 = scalar_lea.vmem %s39_s14, 64  ;;  %p411_p6 = scmp.lt.s32.totalorder %s39_s14, %s39_s14 }
  0x10   :  { %p407_p5 = scmp.ne.s32.totalorder %s39_s14, %s406_s8  ;;  %p412_p7 = scmp.lt.s32.totalorder %s406_s8, %s406_s8 }
  0x12   :  { %p413_p8 = por %p412_p7, %p411_p6 }
  0x14   :  { %p414_p9 = pnand %p413_p8, %p407_p5 }
  0x16   :  { %417 = shalt.err (!%p414_p9)
}
  0x17   :  { %41 = dma.hbm_to_vmem [thread:$0]  %s518_s3, 64, %s39_s14, [#allocation6]  }
  0x18   :  { %418 = dma.done.wait [#allocation4], 128  }
  0x19   :  { %419 = vsyncadd [#allocation4], 4294967168 }
  0x1a   :  { %420 = dma.done.wait [#allocation6], 64  }
  0x1b   :  { %421 = vsyncadd [#allocation6], 4294967232  ;;  %v424_v1 = vmov 0.0   ;;  %vm425_vm0 = vmmov 0   ;;  %vm66_vm1 = vcmask 1043456   ;;  %vm62_vm2 = vcmask 31744  }
  0x1c   :  { %353 = vmatprep.subr.mxu1 %v424_v1  ;;  %355 = vmatprep.mubr.msk.f32.mxu1 %vm425_vm0, %v424_v1  ;;  %v61_v2 = vld [vmem:[#allocation5] sm:$0xf]  ;;  %v60_v3 = vld [vmem:[%s516_s1] sm:$0xff]  ;;  %vm140_vm3 = vcmask 64512   ;;  %v226_v6 = vld [vmem:[%s520_s5 + $0x18] sm:$0xff]  ;;  %vm234_vm4 = vcmask 261120  }
  0x1d   :  { %363 = vmatprep.subr.mxu0 %v424_v1  ;;  %371 = vmatprep.mubr.msk.f32.mxu0 %vm425_vm0, %v424_v1  ;;  %v59_v4 = vld [vmem:[#allocation3] sm:$0xff]  ;;  %v225_v7 = vld [vmem:[%s520_s5 + $0x10] sm:$0xff]  ;;  %v339_v13 = vld [vmem:[%s519_s4] ss:$0 sm:$0xff]  ;;  %vm328_vm5 = vcmask 7168  }
  0x1e   :  { %354 = vmatpush3.msk.msra.mxu1 %vm66_vm1, %v61_v2  ;;  %v58_v5 = vld [vmem:[%s515_s0] sm:$0xff]  ;;  %364 = vmatpush3.msra.mxu0 %v226_v6  ;;  %v224_v8 = vld [vmem:[%s520_s5 + $0x8] sm:$0xff] }
  0x1f   :  { %356 = vmatmul.mubr.msk.f32.vlgmr.msra.gmra.mxu1 %vm62_vm2, %v60_v3  ;;  %358 = vmatprep.subr.mxu1 %v424_v1  ;;  %v223_v9 = vld [vmem:[%s520_s5] sm:$0xff] }
  0x20   :  { %359 = vmatpush3.msra.mxu1 %v59_v4  ;;  %360 = vmatprep.mubr.msk.f32.mxu1 %vm425_vm0, %v424_v1  ;;  %v340_v18 = vld [vmem:[%s521_s6] ss:$0 sm:$0xff] }
  0x21   :  { %365 = vmatprep.subr.mxu0 %v424_v1  ;;  %v342_v22 = vld [vmem:[%s522_s7] ss:$0 sm:$0xff] }
  0x22   :  { %366 = vmatpush3.msra.mxu0 %v225_v7  ;;  %v343_v26 = vld [vmem:[#allocation2] ss:$0 sm:$0xff] }
  0x23   :  { %361 = vmatmul.mubr.msk.f32.vlgmr.msra.gmra.mxu1 %vm140_vm3, %v58_v5  ;;  %367 = vmatprep.subr.mxu0 %v424_v1 }
  0x24   :  { %368 = vmatpush3.msra.mxu0 %v224_v8 }
  0x25   :  { %369 = vmatprep.subr.mxu0 %v424_v1 }
  0x26   :  { %370 = vmatpush3.msra.mxu0 %v223_v9 }
  0xdf   :  { %v136_v10 = vpop.f32.mrf.mxu1 }
  0xe1   :  { %v357_v11 = vpop.f32.mrf.mxu1 }
  0xe3   :  { %v210_v12 = vpop.f32.mrf.mxu1 }
  0xe4   :  { %v211_v14 = vadd.f32 %v210_v12, %v136_v10 }
  0xe5   :  { %v362_v15 = vpop.f32.mrf.mxu1 }
  0xe6   :  { %v221_v16 = vadd.f32 %v339_v13, %v211_v14 }
  0xe8   :  { %v222_v17 = vmax.f32 %v221_v16, 0.0 }
  0xea   :  { %372 = vmatmul.mubr.msk.f32.vlgmr.msra.gmra.mxu0 %vm234_vm4, %v222_v17 }
 0x1aa   :  { %v304_v19 = vpop.f32.mrf.mxu0 }
 0x1ab   :  { %v305_v20 = vadd.f32 %v340_v18, %v304_v19 }
 0x1ac   :  { %v373_v21 = vpop.f32.mrf.mxu0 }
 0x1ad   :  { %v308_v23 = vmax.f32 %v305_v20, 0.0 }
 0x1af   :  { %v316_v24 = vmul.f32 %v342_v22, %v308_v23 }
 0x1b1   :  { %v317_v25 = vsel %vm234_vm4, %v316_v24, 0.0 }
 0x1b2   :  { %318 = vadd.xlane.f32.xlu0 %v317_v25 }
 0x23b   :  { %v319_v27 = vpop.xlane.xlu0 %318 }
 0x23c   :  { %v327_v28 = vadd.f32 %v343_v26, %v319_v27 }
 0x23e   :  { %329 = vst.msk [vmem:[%s524_s9] sm:$0xff] %vm328_vm5, %v327_v28 }
 0x23f   :  { %334 = vsyncpa [#allocation4], 1 }
 0x240   :  { %335 = vsyncpa [#allocation6], 1 }

</bundles_post_ra>
